<compile_context>
chip_gen: v5e
topology: v5e:2x2
jax: 0.10.0
libtpu: 0.0.40
codegen_flags: <defaults>
</compile_context>

<pallas_src>
import functools

import jax
import jax.numpy as jnp
from jax import lax
from jax.experimental import pallas as pl
from jax.experimental.pallas import tpu as pltpu

LANES = 128
SUBLANES = 8
TARGET_BLOCK_BYTES = 4 * 1024 * 1024    # per-input block size
VMEM_LIMIT_BYTES = 48 * 1024 * 1024
UNROLL = 8                              # fori_loop unroll factor


def _round_up(v, m):
    return (v + m - 1) // m * m


def _num_tensorcores():
    # v7x has 2 TensorCores per chip; v5e/v6e have 1 (review: NUM_PARTS=1 there).
    # TODO(synk): on v7x, verify in xprof that the leading "parallel" axis really
    # shards across both cores; switch to pltpu.CORE_PARALLEL / pl.core_map if not.
    try:
        kind = jax.devices()[0].device_kind.lower()
    except Exception:
        return 1
    return 2 if "v7" in kind else 1


def _charbonnier_partial_kernel(x_ref, y_ref, o_ref, *, eps2, block_rows,
                                chunk_rows, blocks_per_part, full_blocks,
                                full_rows, lane_rem, need_mask):
    i = pl.program_id(1)

    @pl.when(i == 0)
    def _():
        o_ref[...] = jnp.zeros_like(o_ref)

    num_chunks = block_rows // chunk_rows
    unroll = max(1, min(UNROLL, num_chunks))

    def accumulate(masked, gb=None):
        def body(k, acc):
            r0 = pl.multiple_of(k * chunk_rows, chunk_rows)
            # Cast inside the kernel: HBM traffic stays at the input dtype and
            # temporaries are only a few vregs per chunk.
            xd = x_ref[pl.ds(r0, chunk_rows), :].astype(jnp.float32)
            yd = y_ref[pl.ds(r0, chunk_rows), :].astype(jnp.float32)
            diff = xd - yd
            val = jnp.sqrt(diff * diff + jnp.float32(eps2))
            if masked:
                # Element-granular validity mask; only trailing blocks run this
                # path (pl.when-gated below). jnp.where is a select, so garbage
                # from edge-overhang reads never taints the sum.
                row_idx = (gb * block_rows + r0 +
                           lax.broadcasted_iota(jnp.int32, (chunk_rows, LANES), 0))
                lane_idx = lax.broadcasted_iota(jnp.int32, (chunk_rows, LANES), 1)
                valid = (row_idx < full_rows) | ((row_idx == full_rows) &
                                                 (lane_idx < lane_rem))
                val = jnp.where(valid, val, 0.0)
            # Fold the chunk to one (8, 128) tile with aligned vreg adds (VPU only).
            if chunk_rows == SUBLANES:
                folded = val
            else:
                folded = val[0:SUBLANES, :]
                for r in range(1, chunk_rows // SUBLANES):
                    folded = folded + val[r * SUBLANES:(r + 1) * SUBLANES, :]
            return acc + folded

        acc = lax.fori_loop(0, num_chunks, body,
                            jnp.zeros((SUBLANES, LANES), jnp.float32),
                            unroll=unroll)
        o_ref[...] += acc

    if not need_mask:
        accumulate(masked=False)
    else:
        # Un-clamped global block index (clamped version is only for the DMA).
        gb = pl.program_id(0) * blocks_per_part + i

        @pl.when(gb < full_blocks)
        def _():
            accumulate(masked=False)            # interior blocks: mask-free

        @pl.when(gb >= full_blocks)
        def _():
            accumulate(masked=True, gb=gb)      # tail / padded / duplicated


def charbonnier_loss(x, y, eps=1e-4, block_bytes=TARGET_BLOCK_BYTES):
    """Pallas TPU implementation of mean(sqrt((x - y)^2 + eps^2))."""
    assert x.shape == y.shape, (x.shape, y.shape)
    if x.dtype != y.dtype:
        ct = jnp.promote_types(x.dtype, y.dtype)
        x = x.astype(ct)
        y = y.astype(ct)

    n = x.size
    itemsize = jnp.dtype(x.dtype).itemsize
    pack = max(1, 4 // itemsize)          # sublane packing (f32:1, bf16:2, i8:4)
    sub_align = SUBLANES * pack           # dtype-aware sublane alignment
    chunk_rows = sub_align                # one packed input vreg per chunk

    xf = x.reshape(-1)
    yf = y.reshape(-1)

    # Lane-dense (rows, 128) view; zero-copy when n is already aligned.
    rows = pl.cdiv(n, LANES)
    rows_alloc = _round_up(max(rows, sub_align), sub_align)
    padded_n = rows_alloc * LANES
    if padded_n != n:
        # TODO(synk): large ragged inputs pay an extra HBM pass here; a
        # manual-DMA tail path (pl.ANY + make_async_copy) would avoid it.
        pad = padded_n - n
        xf = jnp.concatenate([xf, jnp.zeros((pad,), xf.dtype)])
        yf = jnp.concatenate([yf, jnp.zeros((pad,), yf.dtype)])
    x2d = xf.reshape(rows_alloc, LANES)
    y2d = yf.reshape(rows_alloc, LANES)

    max_block_rows = max(sub_align,
                         (block_bytes // (LANES * itemsize)) // sub_align * sub_align)
    block_rows = min(max_block_rows, rows_alloc)
    blocks_total = pl.cdiv(rows_alloc, block_rows)

    nparts = min(_num_tensorcores(), blocks_total) if blocks_total >= 2 else 1
    blocks_per_part = pl.cdiv(blocks_total, nparts)

    full_rows = n // LANES                       # fully-valid (rows,128) rows
    lane_rem = n % LANES                         # valid lanes in the partial row
    full_blocks = n // (block_rows * LANES)      # blocks needing no mask at all
    covered = nparts * blocks_per_part * block_rows * LANES
    need_mask = covered != n

    def in_index_map(p, i):
        # Clamp so over-covering trailing grid steps still DMA in-bounds data;
        # the kernel masks their contribution using the UN-clamped gb.
        return (jnp.minimum(p * blocks_per_part + i, blocks_total - 1), 0)

    kernel = functools.partial(
        _charbonnier_partial_kernel,
        eps2=float(eps) * float(eps),
        block_rows=block_rows,
        chunk_rows=chunk_rows,
        blocks_per_part=blocks_per_part,
        full_blocks=full_blocks,
        full_rows=full_rows,
        lane_rem=lane_rem,
        need_mask=need_mask,
    )

    cost = pl.CostEstimate(
        flops=4 * n,                                   # sub, mul, +eps2, accumulate
        transcendentals=n,                             # sqrt
        bytes_accessed=2 * n * itemsize + nparts * SUBLANES * LANES * 4,
    )

    partials = pl.pallas_call(
        kernel,
        out_shape=jax.ShapeDtypeStruct((nparts * SUBLANES, LANES), jnp.float32),
        grid_spec=pltpu.PrefetchScalarGridSpec(
            num_scalar_prefetch=0,
            grid=(nparts, blocks_per_part),
            in_specs=[
                pl.BlockSpec((block_rows, LANES), in_index_map),
                pl.BlockSpec((block_rows, LANES), in_index_map),
            ],
            out_specs=pl.BlockSpec((SUBLANES, LANES), lambda p, i: (p, 0)),
        ),
        compiler_params=pltpu.CompilerParams(
            dimension_semantics=("parallel", "arbitrary"),
            vmem_limit_bytes=VMEM_LIMIT_BYTES,
        ),
        cost_estimate=cost,
    )(x2d, y2d)

    # Single final cross-lane reduce over at most nparts*8*128 f32 partials.
    return jnp.sum(partials) / jnp.float32(n)


if __name__ == "__main__":
    key = jax.random.PRNGKey(0)
    kx, ky = jax.random.split(key)
    eps = 1e-4

    def ref_loss(a, b):
        d = a.astype(jnp.float32) - b.astype(jnp.float32)
        return jnp.mean(jnp.sqrt(d * d + jnp.float32(eps) ** 2))

    # 1) NCHW input, size multiple of 128*8 -> zero-copy, completely mask-free path.
    shape = (2, 4, 16, 16)
    x = jax.random.normal(kx, shape, dtype=jnp.float32)
    y = jax.random.normal(ky, shape, dtype=jnp.float32)
    loss = jax.block_until_ready(charbonnier_loss(x, y, eps=eps))
    ref = ref_loss(x, y)
    assert jnp.allclose(loss, ref, rtol=1e-5, atol=1e-6), (loss, ref)

    # 2) Ragged size -> padded + masked-tail path.
    shape2 = (2, 3, 7, 11)
    x2 = jax.random.normal(kx, shape2, dtype=jnp.float32)
    y2 = jax.random.normal(ky, shape2, dtype=jnp.float32)
    loss2 = jax.block_until_ready(charbonnier_loss(x2, y2, eps=eps))
    ref2 = ref_loss(x2, y2)
    assert jnp.allclose(loss2, ref2, rtol=1e-5, atol=1e-6), (loss2, ref2)

    # 3) Small block size forces a multi-block grid: exercises cross-step
    #    accumulation, the pl.when fast/masked gating, and array-edge overhang.
    shape3 = (2, 3, 33, 65)
    x3 = jax.random.normal(kx, shape3, dtype=jnp.float32)
    y3 = jax.random.normal(ky, shape3, dtype=jnp.float32)
    loss3 = jax.block_until_ready(charbonnier_loss(x3, y3, eps=eps, block_bytes=16384))
    ref3 = ref_loss(x3, y3)
    assert jnp.allclose(loss3, ref3, rtol=1e-5, atol=1e-6), (loss3, ref3)

    print("KERNEL_OK")
</pallas_src>

<mosaic_0001>
module attributes {stable_mosaic.version = 11 : i64} {
  func.func @_charbonnier_partial_kernel(%arg0: i32, %arg1: i32, %arg2: memref<16x128xf32, #tpu.memory_space<vmem>>, %arg3: memref<16x128xf32, #tpu.memory_space<vmem>>, %arg4: memref<8x128xf32, #tpu.memory_space<vmem>>) attributes {dimension_semantics = [#tpu.dimension_semantics<parallel>, #tpu.dimension_semantics<arbitrary>], iteration_bounds = array<i64: 1, 1>, scalar_prefetch = 0 : i64, scratch_operands = 0 : i64, tpu.core_type = #tpu.core_type<tc>, window_params = [{transform_indices = @transform_0, window_bounds = array<i64: 16, 128>}, {transform_indices = @transform_1, window_bounds = array<i64: 16, 128>}, {transform_indices = @transform_2, window_bounds = array<i64: 8, 128>}]} {
    %c0_i32 = arith.constant 0 : i32
    %0 = arith.cmpi eq, %arg1, %c0_i32 : i32
    %1 = arith.extui %0 : i1 to i32
    %c0_i32_0 = arith.constant 0 : i32
    %2 = arith.cmpi ne, %1, %c0_i32_0 : i32
    scf.if %2 {
      %cst_12 = arith.constant 0.000000e+00 : f32
      %31 = vector.broadcast %cst_12 : f32 to vector<8x128xf32>
      %c0_13 = arith.constant 0 : index
      %c0_14 = arith.constant 0 : index
      %32 = vector.load %arg4[%c0_13, %c0_14] : memref<8x128xf32, #tpu.memory_space<vmem>>, vector<8x128xf32>
      tpu.vector_store %arg4[%c0_13, %c0_14], %31 {strides = array<i32>} : memref<8x128xf32, #tpu.memory_space<vmem>>, vector<8x128xf32>,
    } else {
    }
    %cst = arith.constant 0.000000e+00 : f32
    %3 = vector.broadcast %cst : f32 to vector<8x128xf32>
    %c0_i32_1 = arith.constant 0 : i32
    %c8_i32 = arith.constant 8 : i32
    %4 = arith.muli %c0_i32_1, %c8_i32 : i32
    %5 = tpu.assume_multiple %4, 8 : i32
    %6 = arith.index_cast %5 : i32 to index
    %c0 = arith.constant 0 : index
    %7 = vector.load %arg2[%6, %c0] : memref<16x128xf32, #tpu.memory_space<vmem>>, vector<8x128xf32>
    %8 = arith.index_cast %5 : i32 to index
    %c0_2 = arith.constant 0 : index
    %9 = vector.load %arg3[%8, %c0_2] : memref<16x128xf32, #tpu.memory_space<vmem>>, vector<8x128xf32>
    %10 = arith.subf %7, %9 : vector<8x128xf32>
    %11 = arith.mulf %10, %10 : vector<8x128xf32>
    %cst_3 = arith.constant 9.99999993E-9 : f32
    %12 = vector.broadcast %cst_3 : f32 to vector<8x128xf32>
    %13 = arith.addf %11, %12 : vector<8x128xf32>
    %14 = math.sqrt %13 : vector<8x128xf32>
    %15 = arith.addf %3, %14 : vector<8x128xf32>
    %c1_i32 = arith.constant 1 : i32
    %c8_i32_4 = arith.constant 8 : i32
    %16 = arith.muli %c1_i32, %c8_i32_4 : i32
    %17 = tpu.assume_multiple %16, 8 : i32
    %18 = arith.index_cast %17 : i32 to index
    %c0_5 = arith.constant 0 : index
    %19 = vector.load %arg2[%18, %c0_5] : memref<16x128xf32, #tpu.memory_space<vmem>>, vector<8x128xf32>
    %20 = arith.index_cast %17 : i32 to index
    %c0_6 = arith.constant 0 : index
    %21 = vector.load %arg3[%20, %c0_6] : memref<16x128xf32, #tpu.memory_space<vmem>>, vector<8x128xf32>
    %22 = arith.subf %19, %21 : vector<8x128xf32>
    %23 = arith.mulf %22, %22 : vector<8x128xf32>
    %cst_7 = arith.constant 9.99999993E-9 : f32
    %24 = vector.broadcast %cst_7 : f32 to vector<8x128xf32>
    %25 = arith.addf %23, %24 : vector<8x128xf32>
    %26 = math.sqrt %25 : vector<8x128xf32>
    %27 = arith.addf %15, %26 : vector<8x128xf32>
    %c2_i32 = arith.constant 2 : i32
    %c0_8 = arith.constant 0 : index
    %c0_9 = arith.constant 0 : index
    %28 = vector.load %arg4[%c0_8, %c0_9] : memref<8x128xf32, #tpu.memory_space<vmem>>, vector<8x128xf32>
    %29 = arith.addf %28, %27 : vector<8x128xf32>
    %c0_10 = arith.constant 0 : index
    %c0_11 = arith.constant 0 : index
    %30 = vector.load %arg4[%c0_10, %c0_11] : memref<8x128xf32, #tpu.memory_space<vmem>>, vector<8x128xf32>
    tpu.vector_store %arg4[%c0_10, %c0_11], %29 {strides = array<i32>} : memref<8x128xf32, #tpu.memory_space<vmem>>, vector<8x128xf32>,
    return
  }
  func.func @transform_0(%arg0: i32, %arg1: i32) -> (i32, i32) {
    %c1_i32 = arith.constant 1 : i32
    %0 = arith.muli %arg0, %c1_i32 : i32
    %1 = arith.addi %0, %arg1 : i32
    %c0_i32 = arith.constant 0 : i32
    %2 = arith.minsi %1, %c0_i32 : i32
    %c0_i32_0 = arith.constant 0 : i32
    %c0_i32_1 = arith.constant 0 : i32
    return %2, %c0_i32_0 : i32, i32
  }
  func.func @transform_1(%arg0: i32, %arg1: i32) -> (i32, i32) {
    %c1_i32 = arith.constant 1 : i32
    %0 = arith.muli %arg0, %c1_i32 : i32
    %1 = arith.addi %0, %arg1 : i32
    %c0_i32 = arith.constant 0 : i32
    %2 = arith.minsi %1, %c0_i32 : i32
    %c0_i32_0 = arith.constant 0 : i32
    %c0_i32_1 = arith.constant 0 : i32
    return %2, %c0_i32_0 : i32, i32
  }
  func.func @transform_2(%arg0: i32, %arg1: i32) -> (i32, i32) {
    %c0_i32 = arith.constant 0 : i32
    %c0_i32_0 = arith.constant 0 : i32
    return %arg0, %c0_i32 : i32, i32
  }
}

</mosaic_0001>

<bundles_post_ra>
// kernel: tpu_custom_call.1
= control target key start
LH: loop header
LB: loop body
LE: loop exit
PB: predicated region body
PF: predicated region fallthrough
CT: control target
= control target key end

     0   :  { %7 = vsyncpa [#allocation3], 0  ;;  %s249_s0 = inlined_call_operand.hbm [shape: f32[16,128], index: 0, kind: input, shape index: {}]   ;;  %s250_s1 = inlined_call_operand.hbm [shape: f32[16,128], index: 1, kind: input, shape index: {}]   ;;  %s251_s2 = inlined_call_operand.hbm [shape: f32[8,128], index: 2, kind: output, shape index: {}]  }
   0x1   :  { %8 = vsyncpa [#allocation6], 0 }
   0x2   :  { %9 = vsyncpa [#allocation4], 0  ;;  %s20_s11 = sshll.u32 %s249_s0, 4  ;;  %s220_s12 = smov [#allocation2]   ;;  %s21_s11 = int_to_ptr.hbm [resolvable:$true] %s20_s11 }
   0x3   :  { %s22_s13 = sshll.u32 %s220_s12, 4  ;;  %s39_s16 = sshll.u32 %s250_s1, 4  ;;  %s23_s13 = int_to_ptr.vmem [resolvable:$true] %s22_s13  ;;  %s40_s16 = int_to_ptr.hbm [resolvable:$true] %s39_s16 }
   0x4   :  { %s221_s17 = smov 128   ;;  %s222_s18 = smov 8  }
   0x5   :  { %28 = dma.hbm_to_vmem [thread:$0]  %s21_s11, 256, %s23_s13, [#allocation3], %s221_s17, %s221_s17, %s222_s18  }
   0x6   :  { %s223_s19 = smov [#allocation5]  }
   0x7   :  { %s41_s20 = sshll.u32 %s223_s19, 4  ;;  %s42_s20 = int_to_ptr.vmem [resolvable:$true] %s41_s20 }
   0x8   :  { %47 = dma.hbm_to_vmem [thread:$0]  %s40_s16, 256, %s42_s20, [#allocation6], %s221_s17, %s221_s17, %s222_s18  }
   0x9   :  { %214 = dma.done.wait [#allocation3], 256  }
   0xa   :  { %215 = vsyncadd [#allocation3], 4294967040 }
   0xb   :  { %216 = dma.done.wait [#allocation6], 256  }
   0xc   :  { %217 = vsyncadd [#allocation6], 4294967040  ;;  %v69_v0 = vld [vmem:[#allocation2] sm:$0xff]  ;;  %v70_v1 = vld [vmem:[#allocation5] sm:$0xff]  ;;  %s224_s0 = smov [#allocation7]   ;;  %s117_s23 = sshll.u32 %s251_s2, 4  ;;  %s118_s23 = int_to_ptr.hbm [resolvable:$true] %s117_s23 }
   0xd   :  { %v88_v2 = vld [vmem:[#allocation2 + $0x8] sm:$0xff]  ;;  %v71_v3 = vsub.f32 %v69_v0, %v70_v1  ;;  %v90_v4 = vld [vmem:[#allocation5 + $0x8] sm:$0xff]  ;;  %s115_s1 = sshll.u32 %s224_s0, 4  ;;  %s116_s1 = int_to_ptr.vmem [resolvable:$true] %s115_s1 }
   0xe   :  { %v91_v5 = vsub.f32 %v88_v2, %v90_v4 }
   0xf   :  { %v72_v6 = vmul.f32 %v71_v3, %v71_v3 }
  0x10   :  { %v92_v7 = vmul.f32 %v91_v5, %v91_v5 }
  0x11   :  { %v73_v8 = vadd.f32 1e-08, %v72_v6 }
  0x12   :  { %v93_v9 = vadd.f32 1e-08, %v92_v7 }
  0x13   :  { %138 = vrsqrt.f32 %v73_v8  ;;  %vm81_vm0 = vcmp.eq.f32.partialorder %v73_v8, inf  ;;  %v84_v21 = vand.u32 2147483648, %v73_v8  ;;  %vm83_vm1 = vcmp.eq.f32.partialorder %v73_v8, 0.0 }
  0x14   :  { %140 = vrsqrt.f32 %v93_v9  ;;  %vm101_vm2 = vcmp.eq.f32.partialorder %v93_v9, inf  ;;  %v104_v24 = vand.u32 2147483648, %v93_v9  ;;  %vm103_vm3 = vcmp.eq.f32.partialorder %v93_v9, 0.0 }
  0x19   :  { %v139_v10 = vpop.eup %138 }
  0x1a   :  { %v141_v11 = vpop.eup %140  ;;  %v75_v12 = vmul.f32 %v139_v10, %v73_v8 }
  0x1b   :  { %v95_v13 = vmul.f32 %v141_v11, %v93_v9 }
  0x1c   :  { %v76_v14 = vmul.f32 %v139_v10, %v75_v12 }
  0x1d   :  { %v96_v15 = vmul.f32 %v141_v11, %v95_v13 }
  0x1e   :  { %v77_v16 = vmul.f32 0.5, %v76_v14 }
  0x1f   :  { %v97_v17 = vmul.f32 0.5, %v96_v15 }
  0x20   :  { %v78_v18 = vsub.f32 1.5, %v77_v16 }
  0x21   :  { %v98_v19 = vsub.f32 1.5, %v97_v17 }
  0x22   :  { %v79_v20 = vmul.f32 %v139_v10, %v78_v18 }
  0x23   :  { %v99_v22 = vmul.f32 %v141_v11, %v98_v19 }
  0x24   :  { %v80_v23 = vmul.f32 %v79_v20, %v73_v8 }
  0x25   :  { %v100_v25 = vmul.f32 %v99_v22, %v93_v9 }
  0x26   :  { %v82_v26 = vsel %vm81_vm0, %v73_v8, %v80_v23 }
  0x27   :  { %v85_v27 = vsel %vm83_vm1, %v84_v21, %v82_v26  ;;  %v102_v28 = vsel %vm101_vm2, %v93_v9, %v100_v25 }
  0x28   :  { %v105_v29 = vsel %vm103_vm3, %v104_v24, %v102_v28 }
  0x29   :  { %v106_v30 = vadd.f32 %v105_v29, %v85_v27 }
  0x2b   :  { %109 = vst [vmem:[#allocation7] sm:$0xff] %v106_v30 }
  0x2c   :  { %120 = dma.vmem_to_hbm [thread:$0]  %s116_s1, 128, %s118_s23, [#allocation4]  }
  0x2d   :  { %218 = dma.done.wait [#allocation4], 128  }
  0x2e   :  { %219 = vsyncadd [#allocation4], 4294967168 }
  0x2f   :  { %125 = vsyncpa [#allocation3], 1 }
  0x30   :  { %126 = vsyncpa [#allocation6], 1 }
  0x31   :  { %127 = vsyncpa [#allocation4], 1 }

</bundles_post_ra>
